<compile_context>
chip_gen: v5e
topology: v5e:2x2
jax: 0.10.0
libtpu: 0.0.40
codegen_flags: <defaults>
</compile_context>

<pallas_src>
import functools

import jax
import jax.numpy as jnp
from jax import lax
from jax.experimental import pallas as pl
from jax.experimental.pallas import tpu as pltpu


_LN_EPS = 1e-5
_NEG_BIG = -1e30                       # finite "-inf" (avoids inf-inf -> NaN)
_VMEM_CAP = 60 * 1024 * 1024           # below v7x physical VMEM (64 MiB)
_VMEM_FLOOR = 32 * 1024 * 1024


def _round_up(x, m):
    return (x + m - 1) // m * m


def _layernorm(v, w, b, eps=_LN_EPS):
    mu = jnp.mean(v, axis=-1, keepdims=True)
    var = jnp.mean((v - mu) ** 2, axis=-1, keepdims=True)
    return (v - mu) * lax.rsqrt(var + eps) * w + b


def _gelu_exact(x):
    # PyTorch nn.GELU default = exact erf-based GELU (kept for parity; the
    # tanh approximation would route to the EUP and be faster if parity is
    # not required).
    return 0.5 * x * (1.0 + lax.erf(x / jnp.sqrt(2.0).astype(x.dtype)))


# --------------------------- stage 1: LN1 + QKV ---------------------------

def _qkv_kernel(x_ref, ln1w_ref, ln1b_ref, wqkv_ref, q_ref, k_ref, v_ref):
    x = x_ref[0].astype(jnp.float32)                            # (T, C)
    C = x.shape[-1]
    xn = _layernorm(x, ln1w_ref[0], ln1b_ref[0])
    qkv = jnp.dot(xn.astype(jnp.bfloat16), wqkv_ref[...],       # bf16 x bf16 -> f32
                  preferred_element_type=jnp.float32)           # (T, 3C)
    q_ref[0] = qkv[:, 0:C].astype(q_ref.dtype)                  # scale folded into Wq
    k_ref[0] = qkv[:, C:2 * C].astype(k_ref.dtype)
    v_ref[0] = qkv[:, 2 * C:3 * C].astype(v_ref.dtype)


# ---- stage 2: flash attention over KV tiles + proj + LN2 + MLP + residuals ----

def _attn_mlp_kernel(x_ref, q_ref, k_ref, v_ref,
                     wproj_ref, bproj_ref,
                     ln2w_ref, ln2b_ref,
                     wfc1_ref, bfc1_ref,
                     wfc2_ref, bfc2_ref,
                     out_ref,
                     acc_ref, m_ref, l_ref,
                     *, num_heads, kv_tile, n_valid, mask_keys):
    ki = pl.program_id(2)
    nk = pl.num_programs(2)
    C = acc_ref.shape[-1]
    hd = C // num_heads

    @pl.when(ki == 0)
    def _init():
        acc_ref[...] = jnp.zeros(acc_ref.shape, acc_ref.dtype)
        m_ref[...] = jnp.full(m_ref.shape, _NEG_BIG, m_ref.dtype)
        l_ref[...] = jnp.zeros(l_ref.shape, l_ref.dtype)

    if mask_keys:
        col = lax.broadcasted_iota(jnp.int32, (1, kv_tile), 1) + ki * kv_tile
        key_bias = jnp.where(col < n_valid, 0.0, _NEG_BIG).astype(jnp.float32)

    # Contract the last dims of q_h and k_h -> no explicit transpose.
    contract_last = (((1,), (1,)), ((), ()))
    # Static unroll over heads: keeps all lane offsets static; with the flash
    # KV tiling the per-head temporaries are only (TQ, TK) f32.
    # TODO(synk): pack two heads per 128-lane slice when head_dim < 128 to
    # avoid masked sub-lane loads/stores (perf-only, not semantics).
    for h in range(num_heads):
        lo, hi = h * hd, (h + 1) * hd
        qh = q_ref[0, :, lo:hi]                                 # (TQ, hd) bf16, pre-scaled
        kh = k_ref[0, :, lo:hi]                                 # (TK, hd) bf16
        s = lax.dot_general(qh, kh, contract_last,
                            preferred_element_type=jnp.float32)  # (TQ, TK)
        if mask_keys:
            s = s + key_bias
        m_prev = m_ref[h]                                       # (TQ, 1)
        m_new = jnp.maximum(m_prev, jnp.max(s, axis=-1, keepdims=True))
        alpha = jnp.exp(m_prev - m_new)
        p = jnp.exp(s - m_new)
        l_ref[h] = alpha * l_ref[h] + jnp.sum(p, axis=-1, keepdims=True)
        acc_ref[:, lo:hi] = alpha * acc_ref[:, lo:hi] + jnp.dot(
            p.astype(jnp.bfloat16), v_ref[0, :, lo:hi],
            preferred_element_type=jnp.float32)
        m_ref[h] = m_new

    @pl.when(ki == nk - 1)
    def _epilogue():
        # Normalize each head's accumulator by the softmax denominator.
        for h in range(num_heads):
            lo, hi = h * hd, (h + 1) * hd
            acc_ref[:, lo:hi] = acc_ref[:, lo:hi] * pl.reciprocal(l_ref[h],
                                                                  approx=True)
        x = x_ref[0].astype(jnp.float32)                        # (TQ, C) residual input
        y = jnp.dot(acc_ref[...].astype(jnp.bfloat16), wproj_ref[...],
                    preferred_element_type=jnp.float32) + bproj_ref[0]
        x1 = x + y                                              # residual 1

        xn2 = _layernorm(x1, ln2w_ref[0], ln2b_ref[0])
        h1 = jnp.dot(xn2.astype(jnp.bfloat16), wfc1_ref[...],
                     preferred_element_type=jnp.float32) + bfc1_ref[0]
        h1 = _gelu_exact(h1)
        h2 = jnp.dot(h1.astype(jnp.bfloat16), wfc2_ref[...],
                     preferred_element_type=jnp.float32) + bfc2_ref[0]

        out_ref[0] = (x1 + h2).astype(out_ref.dtype)            # residual 2


# --------------------------- VMEM / tile budgeting ---------------------------

def _stage2_vmem_bytes(t, tk, C, H, nh, x_bytes, single_buffer_weights):
    """Rough stage-2 resident-set estimate from the block shapes."""
    wmul = 1 if single_buffer_weights else 2
    io = 2 * (t * C * x_bytes        # x tile (double-buffered)
              + t * C * 2            # q tile (bf16)
              + 2 * tk * C * 2       # k + v tiles (bf16)
              + t * C * x_bytes)     # out tile
    weights = wmul * 2 * (C * C + 2 * C * H) + 4 * (6 * C + H)
    scratch = 4 * t * C + 2 * nh * t * 128 * 4          # acc + (lane-padded) m, l
    temps = 4 * (4 * t * tk + 2 * t * H + 4 * t * C)    # scores/probs + MLP/LN temps
    return io + weights + scratch + temps


def _select_tile(N, C, H, nh, x_bytes):
    """Sequence tile.  Pads N up instead of shrinking the tile for awkward N."""
    if N <= 256:
        return _round_up(max(N, 8), 8)
    for t in (256, 128):
        if _stage2_vmem_bytes(t, t, C, H, nh, x_bytes, True) <= _VMEM_CAP:
            return t
    return 128


# ---------------------------- parameter preparation ----------------------------

def prepare_block_params(params, *, num_heads):
    """One-time weight prep: fold the attention scale into the Q columns of
    Wqkv and cast the MXU weights to bf16.  Call once per layer, NOT per
    forward call (hoisted out of block_forward per the perf review)."""
    C = params["wqkv"].shape[0]
    hd = C // num_heads
    scale = hd ** (-0.5)
    scale_cols = jnp.concatenate([jnp.full((C,), scale, jnp.float32),
                                  jnp.ones((2 * C,), jnp.float32)])
    prepared = dict(params)
    prepared["wqkv"] = (params["wqkv"].astype(jnp.float32)
                        * scale_cols).astype(jnp.bfloat16)
    prepared["wproj"] = params["wproj"].astype(jnp.bfloat16)
    prepared["wfc1"] = params["wfc1"].astype(jnp.bfloat16)
    prepared["wfc2"] = params["wfc2"].astype(jnp.bfloat16)
    return prepared


# --------------------------------- wrapper ---------------------------------

def block_forward(x, prepared, *, num_heads, seq_tile=None):
    B, N, C = x.shape
    assert C % num_heads == 0, "C must be divisible by num_heads"
    H = prepared["wfc1"].shape[1]
    x_bytes = x.dtype.itemsize

    if seq_tile is None:
        t = _select_tile(N, C, H, num_heads, x_bytes)
    else:
        t = int(seq_tile)
        assert t % 8 == 0, "seq_tile must be a multiple of 8"

    Np = _round_up(N, t)
    x_p = jnp.pad(x, ((0, 0), (0, Np - N), (0, 0))) if Np != N else x
    n_q = Np // t
    n_k = Np // t
    mask_keys = Np != N

    def run(single_buffer_weights):
        vmem_limit = int(min(_VMEM_CAP, max(
            _VMEM_FLOOR,
            1.4 * _stage2_vmem_bytes(t, t, C, H, num_heads, x_bytes,
                                     single_buffer_weights))))

        def const_spec(shape):
            # Grid-invariant operand: fetch once, single-buffer if supported.
            if single_buffer_weights:
                return pl.BlockSpec(shape, lambda *_: (0,) * len(shape),
                                    pipeline_mode=pl.Buffered(1))
            return pl.BlockSpec(shape, lambda *_: (0,) * len(shape))

        # ---- stage 1: LN1 + QKV projection, tiled over (batch, sequence) ----
        q, k, v = pl.pallas_call(
            _qkv_kernel,
            out_shape=(jax.ShapeDtypeStruct((B, Np, C), jnp.bfloat16),) * 3,
            grid_spec=pltpu.PrefetchScalarGridSpec(
                num_scalar_prefetch=0,
                grid=(B, n_q),
                in_specs=[
                    pl.BlockSpec((1, t, C), lambda b, i: (b, i, 0)),   # x
                    const_spec((1, C)),                                # ln1 weight
                    const_spec((1, C)),                                # ln1 bias
                    const_spec((C, 3 * C)),                            # qkv weight (in, out)
                ],
                out_specs=[pl.BlockSpec((1, t, C), lambda b, i: (b, i, 0))] * 3,
            ),
            compiler_params=pltpu.CompilerParams(
                dimension_semantics=("parallel", "parallel"),
                vmem_limit_bytes=vmem_limit),
        )(x_p, prepared["ln1_w"], prepared["ln1_b"], prepared["wqkv"])

        # ---- stage 2: flash attention over KV tiles + proj + LN2 + MLP ----
        kernel = functools.partial(
            _attn_mlp_kernel, num_heads=num_heads, kv_tile=t,
            n_valid=N, mask_keys=mask_keys)
        return pl.pallas_call(
            kernel,
            out_shape=jax.ShapeDtypeStruct((B, Np, C), x.dtype),
            grid_spec=pltpu.PrefetchScalarGridSpec(
                num_scalar_prefetch=0,
                grid=(B, n_q, n_k),
                in_specs=[
                    pl.BlockSpec((1, t, C), lambda b, i, j: (b, i, 0)),  # x (residual)
                    pl.BlockSpec((1, t, C), lambda b, i, j: (b, i, 0)),  # q tile
                    pl.BlockSpec((1, t, C), lambda b, i, j: (b, j, 0)),  # k tile
                    pl.BlockSpec((1, t, C), lambda b, i, j: (b, j, 0)),  # v tile
                    const_spec((C, C)),                                  # proj weight
                    const_spec((1, C)),                                  # proj bias
                    const_spec((1, C)),                                  # ln2 weight
                    const_spec((1, C)),                                  # ln2 bias
                    const_spec((C, H)),                                  # fc1 weight
                    const_spec((1, H)),                                  # fc1 bias
                    const_spec((H, C)),                                  # fc2 weight
                    const_spec((1, C)),                                  # fc2 bias
                ],
                out_specs=pl.BlockSpec((1, t, C), lambda b, i, j: (b, i, 0)),
                scratch_shapes=[
                    pltpu.VMEM((t, C), jnp.float32),             # head-output accumulator
                    pltpu.VMEM((num_heads, t, 1), jnp.float32),  # running max (per head)
                    pltpu.VMEM((num_heads, t, 1), jnp.float32),  # running sum (per head)
                ],
            ),
            compiler_params=pltpu.CompilerParams(
                dimension_semantics=("parallel", "parallel", "arbitrary"),
                vmem_limit_bytes=vmem_limit),
        )(x_p, q, k, v,
          prepared["wproj"], prepared["bproj"],
          prepared["ln2_w"], prepared["ln2_b"],
          prepared["wfc1"], prepared["bfc1"],
          prepared["wfc2"], prepared["bfc2"])

    try:
        out = run(True)
    except Exception:
        # pl.Buffered(1) not supported on this JAX build -> default buffering.
        out = run(False)

    return out[:, :N, :] if Np != N else out


# -------------------------------- reference --------------------------------

def block_reference(x, params, *, num_heads):
    """Pure-JAX f32 reference mirroring PyTorch Block.forward (eval, mask=None)."""
    B, N, C = x.shape
    hd = C // num_heads
    scale = hd ** (-0.5)

    xn = _layernorm(x, params["ln1_w"][0], params["ln1_b"][0])
    qkv = xn @ params["wqkv"]                                           # (B, N, 3C)
    qkv = qkv.reshape(B, N, 3, num_heads, hd).transpose(2, 0, 3, 1, 4)  # (3, B, H, N, hd)
    q, k, v = qkv[0], qkv[1], qkv[2]
    attn = (q @ jnp.swapaxes(k, -2, -1)) * scale
    attn = jax.nn.softmax(attn, axis=-1)
    y = (attn @ v).transpose(0, 2, 1, 3).reshape(B, N, C)
    y = y @ params["wproj"] + params["bproj"][0]
    x1 = x + y
    xn2 = _layernorm(x1, params["ln2_w"][0], params["ln2_b"][0])
    h = _gelu_exact(xn2 @ params["wfc1"] + params["bfc1"][0])
    h = h @ params["wfc2"] + params["bfc2"][0]
    return x1 + h


if __name__ == "__main__":
    num_heads = 4
    mlp_ratio = 4.0
    B, N, C = 2, 10, 32            # N=10 exercises padding + key masking (pads to 16)
    H = int(C * mlp_ratio)

    key = jax.random.PRNGKey(0)
    keys = jax.random.split(key, 12)

    params = {
        "ln1_w": 1.0 + 0.05 * jax.random.normal(keys[0], (1, C), jnp.float32),
        "ln1_b": 0.05 * jax.random.normal(keys[1], (1, C), jnp.float32),
        # qkv_bias=False in the module default -> no qkv bias
        "wqkv":  0.05 * jax.random.normal(keys[2], (C, 3 * C), jnp.float32),
        "wproj": 0.05 * jax.random.normal(keys[3], (C, C), jnp.float32),
        "bproj": 0.05 * jax.random.normal(keys[4], (1, C), jnp.float32),
        "ln2_w": 1.0 + 0.05 * jax.random.normal(keys[5], (1, C), jnp.float32),
        "ln2_b": 0.05 * jax.random.normal(keys[6], (1, C), jnp.float32),
        "wfc1":  0.05 * jax.random.normal(keys[7], (C, H), jnp.float32),
        "bfc1":  0.05 * jax.random.normal(keys[8], (1, H), jnp.float32),
        "wfc2":  0.05 * jax.random.normal(keys[9], (H, C), jnp.float32),
        "bfc2":  0.05 * jax.random.normal(keys[10], (1, C), jnp.float32),
    }

    # One-time weight preparation (hoisted out of the per-call path).
    prepared = prepare_block_params(params, num_heads=num_heads)

    # --- test 1: padded / key-masked path (N=10 -> padded to 16, 1 KV tile) ---
    x = jax.random.normal(keys[11], (B, N, C), jnp.float32)
    out = jax.block_until_ready(block_forward(x, prepared, num_heads=num_heads))
    ref = block_reference(x, params, num_heads=num_heads)
    assert out.shape == (B, N, C)
    # bf16 matmul inputs + approximate reciprocal -> loosened tolerance vs f32 ref.
    assert jnp.allclose(out, ref, atol=2e-2, rtol=2e-2), \
        f"max abs err = {jnp.max(jnp.abs(out - ref))}"

    # --- test 2: multi-tile flash path (2 query tiles x 2 KV tiles) ---
    N2 = 16
    x2 = jax.random.normal(jax.random.PRNGKey(1), (B, N2, C), jnp.float32)
    out2 = jax.block_until_ready(
        block_forward(x2, prepared, num_heads=num_heads, seq_tile=8))
    ref2 = block_reference(x2, params, num_heads=num_heads)
    assert out2.shape == (B, N2, C)
    assert jnp.allclose(out2, ref2, atol=2e-2, rtol=2e-2), \
        f"max abs err = {jnp.max(jnp.abs(out2 - ref2))}"

    print("KERNEL_OK")
</pallas_src>

<mosaic_0001>
module attributes {stable_mosaic.version = 11 : i64} {
  func.func @_qkv_kernel(%arg0: i32, %arg1: i32, %arg2: memref<1x16x32xf32, #tpu.memory_space<vmem>>, %arg3: memref<1x32xf32, #tpu.memory_space<vmem>>, %arg4: memref<1x32xf32, #tpu.memory_space<vmem>>, %arg5: memref<32x96xbf16, #tpu.memory_space<vmem>>, %arg6: memref<1x16x32xbf16, #tpu.memory_space<vmem>>, %arg7: memref<1x16x32xbf16, #tpu.memory_space<vmem>>, %arg8: memref<1x16x32xbf16, #tpu.memory_space<vmem>>) attributes {dimension_semantics = [#tpu.dimension_semantics<parallel>, #tpu.dimension_semantics<parallel>], iteration_bounds = array<i64: 2, 1>, scalar_prefetch = 0 : i64, scratch_operands = 0 : i64, tpu.core_type = #tpu.core_type<tc>, window_params = [{transform_indices = @transform_0, window_bounds = array<i64: 1, 16, 32>}, {pipeline_mode = #tpu.pipeline_mode<synchronous>, transform_indices = @transform_1, window_bounds = array<i64: 1, 32>}, {pipeline_mode = #tpu.pipeline_mode<synchronous>, transform_indices = @transform_2, window_bounds = array<i64: 1, 32>}, {pipeline_mode = #tpu.pipeline_mode<synchronous>, transform_indices = @transform_3, window_bounds = array<i64: 32, 96>}, {transform_indices = @transform_4, window_bounds = array<i64: 1, 16, 32>}, {transform_indices = @transform_5, window_bounds = array<i64: 1, 16, 32>}, {transform_indices = @transform_6, window_bounds = array<i64: 1, 16, 32>}]} {
    %c0 = arith.constant 0 : index
    %c0_0 = arith.constant 0 : index
    %c0_1 = arith.constant 0 : index
    %0 = vector.load %arg2[%c0, %c0_0, %c0_1] : memref<1x16x32xf32, #tpu.memory_space<vmem>>, vector<1x16x32xf32>
    %1 = vector.shape_cast %0 : vector<1x16x32xf32> to vector<16x32xf32>
    %c0_2 = arith.constant 0 : index
    %c0_3 = arith.constant 0 : index
    %2 = vector.load %arg3[%c0_2, %c0_3] : memref<1x32xf32, #tpu.memory_space<vmem>>, vector<1x32xf32>
    %3 = vector.shape_cast %2 : vector<1x32xf32> to vector<32xf32>
    %c0_4 = arith.constant 0 : index
    %c0_5 = arith.constant 0 : index
    %4 = vector.load %arg4[%c0_4, %c0_5] : memref<1x32xf32, #tpu.memory_space<vmem>>, vector<1x32xf32>
    %5 = vector.shape_cast %4 : vector<1x32xf32> to vector<32xf32>
    %cst = arith.constant dense<0.000000e+00> : vector<16xf32>
    %6 = vector.multi_reduction <add>, %1, %cst [1] : vector<16x32xf32> to vector<16xf32>
    %7 = vector.shape_cast %6 : vector<16xf32> to vector<16x1xf32>
    %cst_6 = arith.constant 3.200000e+01 : f32
    %8 = vector.broadcast %cst_6 : f32 to vector<16x1xf32>
    %9 = arith.divf %7, %8 : vector<16x1xf32>
    %10 = vector.broadcast %9 : vector<16x1xf32> to vector<16x32xf32>
    %11 = arith.subf %1, %10 : vector<16x32xf32>
    %12 = arith.mulf %11, %11 : vector<16x32xf32>
    %cst_7 = arith.constant dense<0.000000e+00> : vector<16xf32>
    %13 = vector.multi_reduction <add>, %12, %cst_7 [1] : vector<16x32xf32> to vector<16xf32>
    %14 = vector.shape_cast %13 : vector<16xf32> to vector<16x1xf32>
    %cst_8 = arith.constant 3.200000e+01 : f32
    %15 = vector.broadcast %cst_8 : f32 to vector<16x1xf32>
    %16 = arith.divf %14, %15 : vector<16x1xf32>
    %17 = vector.broadcast %9 : vector<16x1xf32> to vector<16x32xf32>
    %18 = arith.subf %1, %17 : vector<16x32xf32>
    %cst_9 = arith.constant 9.99999974E-6 : f32
    %19 = vector.broadcast %cst_9 : f32 to vector<16x1xf32>
    %20 = arith.addf %16, %19 : vector<16x1xf32>
    %21 = math.rsqrt %20 : vector<16x1xf32>
    %22 = vector.broadcast %21 : vector<16x1xf32> to vector<16x32xf32>
    %23 = arith.mulf %18, %22 : vector<16x32xf32>
    %24 = vector.shape_cast %3 : vector<32xf32> to vector<1x32xf32>
    %25 = vector.broadcast %24 : vector<1x32xf32> to vector<16x32xf32>
    %26 = arith.mulf %23, %25 : vector<16x32xf32>
    %27 = vector.shape_cast %5 : vector<32xf32> to vector<1x32xf32>
    %28 = vector.broadcast %27 : vector<1x32xf32> to vector<16x32xf32>
    %29 = arith.addf %26, %28 : vector<16x32xf32>
    %30 = arith.truncf %29 : vector<16x32xf32> to vector<16x32xbf16>
    %c0_10 = arith.constant 0 : index
    %c0_11 = arith.constant 0 : index
    %31 = vector.load %arg5[%c0_10, %c0_11] : memref<32x96xbf16, #tpu.memory_space<vmem>>, vector<32x96xbf16>
    %cst_12 = arith.constant dense<0.000000e+00> : vector<16x96xf32>
    %32 = tpu.matmul %30, %31, %cst_12 {dimension_numbers = #tpu.dot_dimension_numbers<[1], [0], [0], [1], [0, 0, 1, 1], [], []>} : vector<16x32xbf16>, vector<32x96xbf16>, vector<16x96xf32> -> vector<16x96xf32>
    %33 = vector.extract_strided_slice %32 {offsets = [0, 0], sizes = [16, 32], strides = [1, 1]} : vector<16x96xf32> to vector<16x32xf32>
    %34 = arith.truncf %33 : vector<16x32xf32> to vector<16x32xbf16>
    %c0_13 = arith.constant 0 : index
    %c0_14 = arith.constant 0 : index
    %c0_15 = arith.constant 0 : index
    %35 = vector.load %arg6[%c0_13, %c0_14, %c0_15] : memref<1x16x32xbf16, #tpu.memory_space<vmem>>, vector<1x16x32xbf16>
    %36 = vector.shape_cast %35 : vector<1x16x32xbf16> to vector<16x32xbf16>
    %37 = vector.shape_cast %34 : vector<16x32xbf16> to vector<1x16x32xbf16>
    tpu.vector_store %arg6[%c0_13, %c0_14, %c0_15], %37 {strides = array<i32>} : memref<1x16x32xbf16, #tpu.memory_space<vmem>>, vector<1x16x32xbf16>,
    %38 = vector.extract_strided_slice %32 {offsets = [0, 32], sizes = [16, 32], strides = [1, 1]} : vector<16x96xf32> to vector<16x32xf32>
    %39 = arith.truncf %38 : vector<16x32xf32> to vector<16x32xbf16>
    %c0_16 = arith.constant 0 : index
    %c0_17 = arith.constant 0 : index
    %c0_18 = arith.constant 0 : index
    %40 = vector.load %arg7[%c0_16, %c0_17, %c0_18] : memref<1x16x32xbf16, #tpu.memory_space<vmem>>, vector<1x16x32xbf16>
    %41 = vector.shape_cast %40 : vector<1x16x32xbf16> to vector<16x32xbf16>
    %42 = vector.shape_cast %39 : vector<16x32xbf16> to vector<1x16x32xbf16>
    tpu.vector_store %arg7[%c0_16, %c0_17, %c0_18], %42 {strides = array<i32>} : memref<1x16x32xbf16, #tpu.memory_space<vmem>>, vector<1x16x32xbf16>,
    %43 = vector.extract_strided_slice %32 {offsets = [0, 64], sizes = [16, 32], strides = [1, 1]} : vector<16x96xf32> to vector<16x32xf32>
    %44 = arith.truncf %43 : vector<16x32xf32> to vector<16x32xbf16>
    %c0_19 = arith.constant 0 : index
    %c0_20 = arith.constant 0 : index
    %c0_21 = arith.constant 0 : index
    %45 = vector.load %arg8[%c0_19, %c0_20, %c0_21] : memref<1x16x32xbf16, #tpu.memory_space<vmem>>, vector<1x16x32xbf16>
    %46 = vector.shape_cast %45 : vector<1x16x32xbf16> to vector<16x32xbf16>
    %47 = vector.shape_cast %44 : vector<16x32xbf16> to vector<1x16x32xbf16>
    tpu.vector_store %arg8[%c0_19, %c0_20, %c0_21], %47 {strides = array<i32>} : memref<1x16x32xbf16, #tpu.memory_space<vmem>>, vector<1x16x32xbf16>,
    return
  }
  func.func @transform_0(%arg0: i32, %arg1: i32) -> (i32, i32, i32) {
    %c0_i32 = arith.constant 0 : i32
    %c0_i32_0 = arith.constant 0 : i32
    return %arg0, %arg1, %c0_i32 : i32, i32, i32
  }
  func.func @transform_1(%arg0: i32, %arg1: i32) -> (i32, i32) {
    %c0_i32 = arith.constant 0 : i32
    %c0_i32_0 = arith.constant 0 : i32
    %c0_i32_1 = arith.constant 0 : i32
    return %c0_i32, %c0_i32_0 : i32, i32
  }
  func.func @transform_2(%arg0: i32, %arg1: i32) -> (i32, i32) {
    %c0_i32 = arith.constant 0 : i32
    %c0_i32_0 = arith.constant 0 : i32
    %c0_i32_1 = arith.constant 0 : i32
    return %c0_i32, %c0_i32_0 : i32, i32
  }
  func.func @transform_3(%arg0: i32, %arg1: i32) -> (i32, i32) {
    %c0_i32 = arith.constant 0 : i32
    %c0_i32_0 = arith.constant 0 : i32
    %c0_i32_1 = arith.constant 0 : i32
    return %c0_i32, %c0_i32_0 : i32, i32
  }
  func.func @transform_4(%arg0: i32, %arg1: i32) -> (i32, i32, i32) {
    %c0_i32 = arith.constant 0 : i32
    %c0_i32_0 = arith.constant 0 : i32
    return %arg0, %arg1, %c0_i32 : i32, i32, i32
  }
  func.func @transform_5(%arg0: i32, %arg1: i32) -> (i32, i32, i32) {
    %c0_i32 = arith.constant 0 : i32
    %c0_i32_0 = arith.constant 0 : i32
    return %arg0, %arg1, %c0_i32 : i32, i32, i32
  }
  func.func @transform_6(%arg0: i32, %arg1: i32) -> (i32, i32, i32) {
    %c0_i32 = arith.constant 0 : i32
    %c0_i32_0 = arith.constant 0 : i32
    return %arg0, %arg1, %c0_i32 : i32, i32, i32
  }
}

module attributes {stable_mosaic.version = 11 : i64} {
  func.func @_qkv_kernel(%arg0: i32, %arg1: i32, %arg2: memref<1x16x32xf32, #tpu.memory_space<vmem>>, %arg3: memref<1x32xf32, #tpu.memory_space<vmem>>, %arg4: memref<1x32xf32, #tpu.memory_space<vmem>>, %arg5: memref<32x96xbf16, #tpu.memory_space<vmem>>, %arg6: memref<1x16x32xbf16, #tpu.memory_space<vmem>>, %arg7: memref<1x16x32xbf16, #tpu.memory_space<vmem>>, %arg8: memref<1x16x32xbf16, #tpu.memory_space<vmem>>) attributes {dimension_semantics = [#tpu.dimension_semantics<parallel>, #tpu.dimension_semantics<parallel>], iteration_bounds = array<i64: 2, 1>, scalar_prefetch = 0 : i64, scratch_operands = 0 : i64, tpu.core_type = #tpu.core_type<tc>, window_params = [{transform_indices = @transform_0, window_bounds = array<i64: 1, 16, 32>}, {pipeline_mode = #tpu.pipeline_mode<synchronous>, transform_indices = @transform_1, window_bounds = array<i64: 1, 32>}, {pipeline_mode = #tpu.pipeline_mode<synchronous>, transform_indices = @transform_2, window_bounds = array<i64: 1, 32>}, {pipeline_mode = #tpu.pipeline_mode<synchronous>, transform_indices = @transform_3, window_bounds = array<i64: 32, 96>}, {transform_indices = @transform_4, window_bounds = array<i64: 1, 16, 32>}, {transform_indices = @transform_5, window_bounds = array<i64: 1, 16, 32>}, {transform_indices = @transform_6, window_bounds = array<i64: 1, 16, 32>}]} {
    %c0 = arith.constant 0 : index
    %c0_0 = arith.constant 0 : index
    %c0_1 = arith.constant 0 : index
    %0 = vector.load %arg2[%c0, %c0_0, %c0_1] : memref<1x16x32xf32, #tpu.memory_space<vmem>>, vector<1x16x32xf32>
    %1 = vector.shape_cast %0 : vector<1x16x32xf32> to vector<16x32xf32>
    %c0_2 = arith.constant 0 : index
    %c0_3 = arith.constant 0 : index
    %2 = vector.load %arg3[%c0_2, %c0_3] : memref<1x32xf32, #tpu.memory_space<vmem>>, vector<1x32xf32>
    %3 = vector.shape_cast %2 : vector<1x32xf32> to vector<32xf32>
    %c0_4 = arith.constant 0 : index
    %c0_5 = arith.constant 0 : index
    %4 = vector.load %arg4[%c0_4, %c0_5] : memref<1x32xf32, #tpu.memory_space<vmem>>, vector<1x32xf32>
    %5 = vector.shape_cast %4 : vector<1x32xf32> to vector<32xf32>
    %cst = arith.constant dense<0.000000e+00> : vector<16xf32>
    %6 = vector.multi_reduction <add>, %1, %cst [1] : vector<16x32xf32> to vector<16xf32>
    %7 = vector.shape_cast %6 : vector<16xf32> to vector<16x1xf32>
    %cst_6 = arith.constant 3.200000e+01 : f32
    %8 = vector.broadcast %cst_6 : f32 to vector<16x1xf32>
    %9 = arith.divf %7, %8 : vector<16x1xf32>
    %10 = vector.broadcast %9 : vector<16x1xf32> to vector<16x32xf32>
    %11 = arith.subf %1, %10 : vector<16x32xf32>
    %12 = arith.mulf %11, %11 : vector<16x32xf32>
    %cst_7 = arith.constant dense<0.000000e+00> : vector<16xf32>
    %13 = vector.multi_reduction <add>, %12, %cst_7 [1] : vector<16x32xf32> to vector<16xf32>
    %14 = vector.shape_cast %13 : vector<16xf32> to vector<16x1xf32>
    %cst_8 = arith.constant 3.200000e+01 : f32
    %15 = vector.broadcast %cst_8 : f32 to vector<16x1xf32>
    %16 = arith.divf %14, %15 : vector<16x1xf32>
    %17 = vector.broadcast %9 : vector<16x1xf32> to vector<16x32xf32>
    %18 = arith.subf %1, %17 : vector<16x32xf32>
    %cst_9 = arith.constant 9.99999974E-6 : f32
    %19 = vector.broadcast %cst_9 : f32 to vector<16x1xf32>
    %20 = arith.addf %16, %19 : vector<16x1xf32>
    %21 = math.rsqrt %20 : vector<16x1xf32>
    %22 = vector.broadcast %21 : vector<16x1xf32> to vector<16x32xf32>
    %23 = arith.mulf %18, %22 : vector<16x32xf32>
    %24 = vector.shape_cast %3 : vector<32xf32> to vector<1x32xf32>
    %25 = vector.broadcast %24 : vector<1x32xf32> to vector<16x32xf32>
    %26 = arith.mulf %23, %25 : vector<16x32xf32>
    %27 = vector.shape_cast %5 : vector<32xf32> to vector<1x32xf32>
    %28 = vector.broadcast %27 : vector<1x32xf32> to vector<16x32xf32>
    %29 = arith.addf %26, %28 : vector<16x32xf32>
    %30 = arith.truncf %29 : vector<16x32xf32> to vector<16x32xbf16>
    %c0_10 = arith.constant 0 : index
    %c0_11 = arith.constant 0 : index
    %31 = vector.load %arg5[%c0_10, %c0_11] : memref<32x96xbf16, #tpu.memory_space<vmem>>, vector<32x96xbf16>
    %cst_12 = arith.constant dense<0.000000e+00> : vector<16x96xf32>
    %32 = tpu.matmul %30, %31, %cst_12 {dimension_numbers = #tpu.dot_dimension_numbers<[1], [0], [0], [1], [0, 0, 1, 1], [], []>} : vector<16x32xbf16>, vector<32x96xbf16>, vector<16x96xf32> -> vector<16x96xf32>
    %33 = vector.extract_strided_slice %32 {offsets = [0, 0], sizes = [16, 32], strides = [1, 1]} : vector<16x96xf32> to vector<16x32xf32>
    %34 = arith.truncf %33 : vector<16x32xf32> to vector<16x32xbf16>
    %c0_13 = arith.constant 0 : index
    %c0_14 = arith.constant 0 : index
    %c0_15 = arith.constant 0 : index
    %35 = vector.load %arg6[%c0_13, %c0_14, %c0_15] : memref<1x16x32xbf16, #tpu.memory_space<vmem>>, vector<1x16x32xbf16>
    %36 = vector.shape_cast %35 : vector<1x16x32xbf16> to vector<16x32xbf16>
    %37 = vector.shape_cast %34 : vector<16x32xbf16> to vector<1x16x32xbf16>
    tpu.vector_store %arg6[%c0_13, %c0_14, %c0_15], %37 {strides = array<i32>} : memref<1x16x32xbf16, #tpu.memory_space<vmem>>, vector<1x16x32xbf16>,
    %38 = vector.extract_strided_slice %32 {offsets = [0, 32], sizes = [16, 32], strides = [1, 1]} : vector<16x96xf32> to vector<16x32xf32>
    %39 = arith.truncf %38 : vector<16x32xf32> to vector<16x32xbf16>
    %c0_16 = arith.constant 0 : index
    %c0_17 = arith.constant 0 : index
    %c0_18 = arith.constant 0 : index
    %40 = vector.load %arg7[%c0_16, %c0_17, %c0_18] : memref<1x16x32xbf16, #tpu.memory_space<vmem>>, vector<1x16x32xbf16>
    %41 = vector.shape_cast %40 : vector<1x16x32xbf16> to vector<16x32xbf16>
    %42 = vector.shape_cast %39 : vector<16x32xbf16> to vector<1x16x32xbf16>
    tpu.vector_store %arg7[%c0_16, %c0_17, %c0_18], %42 {strides = array<i32>} : memref<1x16x32xbf16, #tpu.memory_space<vmem>>, vector<1x16x32xbf16>,
    %43 = vector.extract_strided_slice %32 {offsets = [0, 64], sizes = [16, 32], strides = [1, 1]} : vector<16x96xf32> to vector<16x32xf32>
    %44 = arith.truncf %43 : vector<16x32xf32> to vector<16x32xbf16>
    %c0_19 = arith.constant 0 : index
    %c0_20 = arith.constant 0 : index
    %c0_21 = arith.constant 0 : index
    %45 = vector.load %arg8[%c0_19, %c0_20, %c0_21] : memref<1x16x32xbf16, #tpu.memory_space<vmem>>, vector<1x16x32xbf16>
    %46 = vector.shape_cast %45 : vector<1x16x32xbf16> to vector<16x32xbf16>
    %47 = vector.shape_cast %44 : vector<16x32xbf16> to vector<1x16x32xbf16>
    tpu.vector_store %arg8[%c0_19, %c0_20, %c0_21], %47 {strides = array<i32>} : memref<1x16x32xbf16, #tpu.memory_space<vmem>>, vector<1x16x32xbf16>,
    return
  }
  func.func @transform_0(%arg0: i32, %arg1: i32) -> (i32, i32, i32) {
    %c0_i32 = arith.constant 0 : i32
    %c0_i32_0 = arith.constant 0 : i32
    return %arg0, %arg1, %c0_i32 : i32, i32, i32
  }
  func.func @transform_1(%arg0: i32, %arg1: i32) -> (i32, i32) {
    %c0_i32 = arith.constant 0 : i32
    %c0_i32_0 = arith.constant 0 : i32
    %c0_i32_1 = arith.constant 0 : i32
    return %c0_i32, %c0_i32_0 : i32, i32
  }
  func.func @transform_2(%arg0: i32, %arg1: i32) -> (i32, i32) {
    %c0_i32 = arith.constant 0 : i32
    %c0_i32_0 = arith.constant 0 : i32
    %c0_i32_1 = arith.constant 0 : i32
    return %c0_i32, %c0_i32_0 : i32, i32
  }
  func.func @transform_3(%arg0: i32, %arg1: i32) -> (i32, i32) {
    %c0_i32 = arith.constant 0 : i32
    %c0_i32_0 = arith.constant 0 : i32
    %c0_i32_1 = arith.constant 0 : i32
    return %c0_i32, %c0_i32_0 : i32, i32
  }
  func.func @transform_4(%arg0: i32, %arg1: i32) -> (i32, i32, i32) {
    %c0_i32 = arith.constant 0 : i32
    %c0_i32_0 = arith.constant 0 : i32
    return %arg0, %arg1, %c0_i32 : i32, i32, i32
  }
  func.func @transform_5(%arg0: i32, %arg1: i32) -> (i32, i32, i32) {
    %c0_i32 = arith.constant 0 : i32
    %c0_i32_0 = arith.constant 0 : i32
    return %arg0, %arg1, %c0_i32 : i32, i32, i32
  }
  func.func @transform_6(%arg0: i32, %arg1: i32) -> (i32, i32, i32) {
    %c0_i32 = arith.constant 0 : i32
    %c0_i32_0 = arith.constant 0 : i32
    return %arg0, %arg1, %c0_i32 : i32, i32, i32
  }
}

</mosaic_0001>

<bundles_post_ra>
// kernel: tpu_custom_call.1
= control target key start
LH: loop header
LB: loop body
LE: loop exit
PB: predicated region body
PF: predicated region fallthrough
CT: control target
= control target key end

     0   :  { %s1371_s0 = inlined_call_operand.hbm [shape: f32[2,16,32], index: 0, kind: input, shape index: {}]   ;;  %s1372_s1 = inlined_call_operand.hbm [shape: f32[1,32], index: 1, kind: input, shape index: {}]   ;;  %s1373_s2 = inlined_call_operand.vmem [shape: f32[1,32], index: 2, kind: input, shape index: {}]   ;;  %s1374_s3 = inlined_call_operand.hbm [shape: bf16[32,96], index: 3, kind: input, shape index: {}]   ;;  %s1375_s4 = inlined_call_operand.hbm [shape: bf16[2,16,32], index: 4, kind: output, shape index: {0}]   ;;  %s1376_s5 = inlined_call_operand.hbm [shape: bf16[2,16,32], index: 5, kind: output, shape index: {1}]   ;;  %s1377_s6 = inlined_call_operand.hbm [shape: bf16[2,16,32], index: 6, kind: output, shape index: {2}]  }
   0x1   :  { %1382 = sst [smem:[#allocation18_spill]] %s1372_s1 }
   0x2   :  { %1383 = sst [smem:[#allocation19_spill]] %s1374_s3 }
   0x3   :  { %12 = vsyncpa [#allocation3], 0 }
   0x4   :  { %14 = vsyncpa [#allocation3 + $0x1], 0 }
   0x5   :  { %15 = vsyncpa [#allocation6], 0 }
   0x6   :  { %16 = vsyncpa [#allocation4], 0 }
   0x7   :  { %18 = vsyncpa [#allocation4 + $0x1], 0 }
   0x8   :  { %19 = vsyncpa [#allocation10], 0 }
   0x9   :  { %21 = vsyncpa [#allocation10 + $0x1], 0  ;;  %s1146_s21 = smov 0   ;;  %s1148_s22 = smov 0  }
   0xa   :  { %s1150_s23 = smov 0   ;;  %s1152_s24 = smov 0  }
   0xb   :  { %s1154_s25 = smov 0   ;;  %s1156_s26 = smov 0  }
   0xc LB: > { %1384 = sst [smem:[#allocation16_spill]] %s1099_s26  ;;  %s1177_s27 = sadd.s32 4294967295, %s1099_s26   ;;  %s1099_s26 = sphi %s1156_s26, %s27_s26   ;;  %s1095_s25 = sphi %s1154_s25, %s1402_s25   ;;  %s1091_s24 = sphi %s1152_s24, %s1401_s24   ;;  %s1087_s23 = sphi %s1150_s23, %s1400_s23   ;;  %s1083_s22 = sphi %s1148_s22, %s1399_s22   ;;  %s1079_s21 = sphi %s1146_s21, %s1398_s21  }
   0xd   : > { %s1378_s28 = sadd.s32 4294967294, %s1099_s26   ;;  %p55_p0 = scmp.ne.s32.totalorder %s1087_s23, %s1083_s22 }
   0xe   : > { %p56_p1 = scmp.eq.s32.totalorder %s1099_s26, 0  ;;  %p61_p2 = scmp.ne.s32.totalorder %s1083_s22, %s1079_s21 }
   0xf   : > { %p62_p3 = scmp.eq.s32.totalorder %s1177_s27, 0  ;;  %p150_p4 = scmp.eq.s32.totalorder %s1177_s27, 1 }
  0x10   : > { %p1188_p5 = por %p56_p1, %p55_p0  ;;  %p156_p6 = scmp.eq.s32.totalorder %s1378_s28, 1 }
  0x11   : > { %p1196_p7 = por %p62_p3, %p61_p2  ;;  %p1200_p8 = por %p150_p4, %p55_p0 }
  0x12   : > { %p1204_p9 = por %p156_p6, %p61_p2  ;;  %p714_p10 = scmp.ge.s32.totalorder %s1099_s26, 1 }
  0x13   : > { %p219_p11 = scmp.lt.s32.totalorder %s1099_s26, 3  ;;  %s1390_s1 = sld [smem:[#allocation18_spill]] }
  0x14   : > { %s1388_s9 = scalar_select %p1204_p9, 1, 0 }
  0x15   : > { %p1213_p12 = pnand %p714_p10, %p219_p11  ;;  %s1101_s14 = smov [#allocation5]  }
  0x16   : > { %1389 = sst [smem:[#allocation17_spill]] %s1388_s9  ;;  %s233_s15 = sshll.u32 %s1101_s14, 4  ;;  %s234_s15 = int_to_ptr.vmem [resolvable:$true] %s233_s15 }
  0x17   : > { %p717_p13 = scmp.ge.s32.totalorder %s1099_s26, 2  ;;  %p770_p0 = pneg %p1213_p12 }
  0x18   : > { %p793_p1 = scmp.lt.s32.totalorder %s1099_s26, 2  ;;  %s1392_s3 = sld [smem:[#allocation19_spill]] }
  0x19   : > { %s231_s12 = sshll.u32 %s1390_s1, 4  ;;  %p771_p2 = pnand %p770_p0, %p62_p3  ;;  %s232_s12 = int_to_ptr.hbm [resolvable:$true] %s231_s12 }
  0x1a   : > { %p1228_p4 = pnand %p793_p1, %p1188_p5  ;;  %s1102_s20 = smov [#allocation7]  }
  0x1b   : > { %s247_s10 = sshll.u32 %s1102_s20, 4  ;;  %s1103_s11 = smov 64   ;;  %s248_s10 = int_to_ptr.vmem [resolvable:$true] %s247_s10 }
  0x1c   : > { %773 = dma.hbm_to_vmem [thread:$0]  (!%p771_p2), %s232_s12, 16, %s234_s15, [#allocation6]  }
  0x1d   : > { %s1104_s14 = smov 4   ;;  %s261_s16 = sand.u32 1, %s1087_s23  }
  0x1e   : > { %s245_s18 = sshll.u32 %s1392_s3, 4  ;;  %s39_s17 = sadd.s32 1, %s1095_s25  ;;  %s246_s18 = int_to_ptr.hbm [resolvable:$true] %s245_s18 }
  0x1f   : > { %776 = dma.hbm_to_vmem [thread:$0]  (!%p771_p2), %s246_s18, 256, %s248_s10, [#allocation6], %s1103_s11, %s1103_s11, %s1104_s14  }
  0x20   : > { %s718_s28 = sshll.u32 %s261_s16, 4  ;;  %p41_p6 = scmp.ge.s32.totalorder %s39_s17, 2 }
  0x21   : > { %s748_s30 = sshll.u32 %s1095_s25, 4  ;;  %s265_s29 = scalar_lea.vmem [#allocation2], %s718_s28 }
  0x22   : > { %s275_s1 = sshll.u32 %s265_s29, 4  ;;  %s1404_s17 = smov (%p41_p6, %s39_s17), 0  ;;  %s276_s1 = int_to_ptr.vmem [resolvable:$true] %s275_s1 }
  0x23   : > { %s272_s12 = scalar_lea.hbm %s1371_s0, %s748_s30  ;;  %s43_s15 = ssub.s32 %s1095_s25, %s1404_s17 }
  0x24   : > { %s273_s26 = sshll.u32 %s272_s12, 4  ;;  %p46_p5 = scmp.eq.s32.totalorder %s43_s15, 0  ;;  %s274_s26 = int_to_ptr.hbm [resolvable:$true] %s273_s26 }
  0x25   : > { %s1394_s18 = sadd.s32 1, %s1087_s23  ;;  %s262_s11 = scalar_lea.sflag [#allocation3], %s261_s16 }
  0x26   : > { %s1245_s10 = scalar_select %p46_p5, %s1087_s23, %s1394_s18  }
  0x27   : > { %s1105_s14 = smov 128   ;;  %s1106_s9 = smov 8  }
  0x28   : > { %780 = dma.hbm_to_vmem [thread:$0]  (!%p1228_p4), %s274_s26, 256, %s276_s1, %s262_s11, %s1105_s14, %s1105_s14, %s1106_s9  }
  0x29   : > { %287 = sbr.rel (%p1213_p12) target bundleno = 582 (0x246), region = 36  ;;  %s1252_s3 = sand.u32 (!%p1213_p12), 1, %s1083_s22  }
  0x2a   : > { %s722_s28 = sshll.u32 (!%p1213_p12), %s1252_s3, 4  ;;  %s290_s29 = scalar_lea.sflag (!%p1213_p12), [#allocation3], %s1252_s3 }
  0x2b   : > { %s293_s30 = scalar_lea.vmem (!%p1213_p12), [#allocation2], %s722_s28 }
  0x2e   : > { %1062 = dma.done.wait (%p1196_p7), %s290_s29, 256  }
  0x2f   : > { %1064 = vsyncadd (%p1196_p7), %s290_s29, 4294967040 }
  0x30   : > { %1066 = dma.done.wait (%p62_p3), [#allocation6], 272  }
  0x31   : > { %1068 = vsyncadd (%p62_p3), [#allocation6], 4294967024  ;;  %vm352_vm0 = vcmask 261120   ;;  %v348_v0 = vld [vmem:[%s293_s30] sm:$0xff]  ;;  %v349_v2 = vld [vmem:[%s293_s30 + $0x8] sm:$0xff]  ;;  %v1107_v4 = vmov 32.0  }
  0x32   : > { %v353_v1 = vsel %vm352_vm0, %v348_v0, 0.0  ;;  %v356_v3 = vsel %vm352_vm0, %v349_v2, 0.0  ;;  %857 = vrcp.f32 %v1107_v4  ;;  %v750_v21 = vld [vmem:[#allocation7 + $0x8] sm:$0xff]  ;;  %v749_v23 = vld [vmem:[#allocation7] sm:$0xff]  ;;  %v855_v42 = vld [vmem:[#allocation5] ss:$0 sm:$0xff] }
  0x33   : > { %354 = vadd.xlane.f32.xlu0 %v353_v1  ;;  %440 = vmatpush.bf16.msra.mxu0 %v750_v21  ;;  %v856_v47 = vld [vmem:[%s1373_s2] ss:$0 sm:$0xff]  ;;  %s1273_s7 = sshll.u32 %s1252_s3, 3  ;;  %vm450_vm8 = vcmask 257024   ;;  %s1276_s9 = sshll.u32 %s1091_s24, 3 }
  0x34   : > { %s328_s13 = scalar_lea.vmem [#allocation8], %s1273_s7  ;;  %s1108_s19 = smov 64  }
  0x35   : > { %s1109_s16 = smov 96   ;;  %s495_s15 = scalar_lea.hbm %s1375_s4, %s1276_s9 }
  0x36   : > { %s496_s18 = sshll.u32 %s328_s13, 4  ;;  %s498_s11 = sshll.u32 %s495_s15, 4  ;;  %s497_s18 = int_to_ptr.vmem [resolvable:$true] %s496_s18  ;;  %s499_s11 = int_to_ptr.hbm [resolvable:$true] %s498_s11 }
  0x37   : > { %441 = vmatpush.bf16.msra.mxu0 %v749_v23  ;;  %s472_s24 = scalar_lea.sflag [#allocation4], %s1252_s3  ;;  %s967_s14 = sshra.s32 %s499_s11, 4  ;;  %s968_s14 = int_to_ptr.hbm [resolvable:$true] %s967_s14 }
  0x38   : > { %v858_v5 = vpop.eup %857  ;;  %s969_s28 = scalar_lea.hbm %s968_s14, 8  ;;  %s973_s1 = scalar_lea.hbm %s1375_s4, 16 }
  0x39   : > { %v360_v6 = vmul.f32 32.0, %v858_v5  ;;  %vm364_vm1 = vweird.f32 %v858_v5  ;;  %p970_p3 = scmp.ne.s32.totalorder %s968_s14, %s969_s28  ;;  %p974_p11 = scmp.lt.s32.totalorder %s968_s14, %s1375_s4 }
  0x3a   : > { %p975_p12 = scmp.lt.s32.totalorder %s973_s1, %s969_s28 }
  0x3b   : > { %357 = vadd.xlane.f32.xlu0 %v356_v3  ;;  %v361_v7 = vsub.f32 1.0, %v360_v6  ;;  %p971_p7 = pnand %p970_p3, %p1200_p8 }
  0x3c   : > { %p976_p0 = por %p975_p12, %p974_p11 }
  0x3d   : > { %v362_v8 = vmul.f32 %v858_v5, %v361_v7  ;;  %p972_p10 = pneg %p971_p7 }
  0x3f   : > { %v363_v9 = vadd.f32 %v858_v5, %v362_v8  ;;  %p977_p1 = pnand %p976_p0, %p972_p10 }
  0x41   : > { %v365_v10 = vsel %vm364_vm1, %v858_v5, %v363_v9 }
  0xa6   : > { %v355_v11 = vpop.xlane.xlu0 %354 }
  0xa7   : > { %v366_v12 = vmul.f32 %v365_v10, %v355_v11 }
  0xa9   : > { %v368_v13 = vsub.f32 %v348_v0, %v366_v12 }
  0xab   : > { %v370_v14 = vmul.f32 %v368_v13, %v368_v13 }
  0xad   : > { %v372_v15 = vsel %vm352_vm0, %v370_v14, 0.0 }
  0xae   : > { %373 = vadd.xlane.f32.xlu1 %v372_v15  ;;  %v358_v16 = vpop.xlane.xlu0 %357 }
  0xaf   : > { %v367_v17 = vmul.f32 %v365_v10, %v358_v16 }
  0xb1   : > { %v369_v18 = vsub.f32 %v349_v2, %v367_v17 }
  0xb3   : > { %v371_v19 = vmul.f32 %v369_v18, %v369_v18 }
  0xb5   : > { %v375_v20 = vsel %vm352_vm0, %v371_v19, 0.0 }
  0xb6   : > { %376 = vadd.xlane.f32.xlu1 %v375_v20 }
 0x121   : > { %v374_v22 = vpop.xlane.xlu1 %373 }
 0x122   : > { %v378_v24 = vmul.f32 %v374_v22, %v365_v10 }
 0x124   : > { %v380_v25 = vadd.f32 1e-05, %v378_v24 }
 0x126   : > { %859 = vrsqrt.f32 %v380_v25  ;;  %vm388_vm3 = vweird.f32 %v380_v25 }
 0x129   : > { %v377_v26 = vpop.xlane.xlu1 %376 }
 0x12a   : > { %v379_v27 = vmul.f32 %v377_v26, %v365_v10 }
 0x12c   : > { %v860_v28 = vpop.eup %859  ;;  %v381_v29 = vadd.f32 1e-05, %v379_v27 }
 0x12d   : > { %v383_v30 = vmul.f32 %v860_v28, %v380_v25  ;;  %vm389_vm2 = vweird.f32 %v860_v28 }
 0x12e   : > { %861 = vrsqrt.f32 %v381_v29  ;;  %vm390_vm4 = vmor %vm388_vm3, %vm389_vm2  ;;  %vm398_vm6 = vweird.f32 %v381_v29 }
 0x12f   : > { %v384_v31 = vmul.f32 %v860_v28, %v383_v30 }
 0x131   : > { %v385_v32 = vmul.f32 0.5, %v384_v31 }
 0x133   : > { %v386_v33 = vsub.f32 1.5, %v385_v32 }
 0x134   : > { %v862_v34 = vpop.eup %861 }
 0x135   : > { %v387_v35 = vmul.f32 %v860_v28, %v386_v33  ;;  %v393_v36 = vmul.f32 %v862_v34, %v381_v29  ;;  %vm399_vm5 = vweird.f32 %v862_v34 }
 0x136   : > { %vm400_vm7 = vmor %vm398_vm6, %vm399_vm5 }
 0x137   : > { %v394_v37 = vmul.f32 %v862_v34, %v393_v36  ;;  %v391_v38 = vsel %vm390_vm4, %v860_v28, %v387_v35 }
 0x138   : > { %v402_v41 = vmul.f32 %v391_v38, %v368_v13 }
 0x139   : > { %v395_v39 = vmul.f32 0.5, %v394_v37 }
 0x13a   : > { %v407_v46 = vmul.f32 %v855_v42, %v402_v41 }
 0x13b   : > { %v396_v40 = vsub.f32 1.5, %v395_v39 }
 0x13c   : > { %v412_v49 = vadd.f32 %v856_v47, %v407_v46 }
 0x13d   : > { %v397_v43 = vmul.f32 %v862_v34, %v396_v40 }
 0x13f   : > { %v401_v44 = vsel %vm400_vm7, %v862_v34, %v397_v43 }
 0x140   : > { %v403_v45 = vmul.f32 %v401_v44, %v369_v18 }
 0x142   : > { %v408_v48 = vmul.f32 %v855_v42, %v403_v45 }
 0x144   : > { %v413_v50 = vadd.f32 %v856_v47, %v408_v48 }
 0x146   : > { %v414_v51 = vpack.c.bf16 %v413_v50, %v412_v49 }
 0x148   : > { %736 = vmatmul.msk.bf16.vlgmr.msra.gmra.mxu0 %vm352_vm0, %v414_v51 }
 0x1c5   : > { %v443_v52 = vpop.f32.mrf.mxu0 }
 0x1c6   : > { %v448_v53 = vpack.c.bf16 %v443_v52, %v443_v52 }
 0x1c8   : > { %451 = vst.msk [vmem:[%s328_s13] sm:$0xf] %vm450_vm8, %v448_v53  ;;  %463 = vrot.lane.b32.xlu0 %v448_v53, %s1108_s19  ;;  %455 = vrot.lane.b32.xlu2 %v448_v53, %s1109_s16 }
 0x1cd   : > { %v445_v54 = vpop.f32.mrf.mxu0 }
 0x1ce   : > { %v449_v55 = vpack.c.bf16 %v445_v54, %v445_v54 }
 0x1d0   : > { %452 = vst.msk [vmem:[%s328_s13 + $0x4] sm:$0xf] %vm450_vm8, %v449_v55  ;;  %465 = vrot.lane.b32.xlu1 %v449_v55, %s1108_s19  ;;  %457 = vrot.lane.b32.xlu2 %v449_v55, %s1109_s16 }
 0x1d1   : > { %980 = shalt.err (!%p977_p1)
}
 0x1d2   : > { %s1110_s3 = smov 4   ;;  %s335_s13 = scalar_lea.vmem [#allocation9], %s1273_s7 }
 0x1d3   : > { %764 = dma.vmem_to_hbm [thread:$0]  (%p1200_p8), %s497_s18, 128, %s499_s11, %s472_s24, %s1108_s19, %s1108_s19, %s1110_s3  }
 0x1d4   : > { %s514_s15 = scalar_lea.hbm %s1376_s5, %s1276_s9  ;;  %s515_s14 = sshll.u32 %s335_s13, 4  ;;  %s516_s14 = int_to_ptr.vmem [resolvable:$true] %s515_s14 }
 0x1d5   : > { %s476_s28 = sand.u32 1, %s1177_s27   ;;  %s517_s29 = sshll.u32 %s514_s15, 4  ;;  %s518_s29 = int_to_ptr.hbm [resolvable:$true] %s517_s29 }
 0x1d6   : > { %s1309_s30 = scalar_lea.sflag [#allocation10], %s476_s28  ;;  %s995_s18 = sshra.s32 %s518_s29, 4  ;;  %s996_s18 = int_to_ptr.hbm [resolvable:$true] %s995_s18 }
 0x1d7   : > { %s997_s11 = scalar_lea.hbm %s996_s18, 8  ;;  %s1001_s26 = scalar_lea.hbm %s1376_s5, 16 }
 0x1d8   : > { %p998_p2 = scmp.ne.s32.totalorder %s996_s18, %s997_s11  ;;  %p1002_p5 = scmp.lt.s32.totalorder %s996_s18, %s1376_s5 }
 0x1d9   : > { %p1003_p3 = scmp.lt.s32.totalorder %s1001_s26, %s997_s11 }
 0x1da   : > { %p999_p4 = pnand %p998_p2, %p1200_p8 }
 0x1db   : > { %p1004_p7 = por %p1003_p3, %p1002_p5 }
 0x1dc   : > { %p1000_p6 = pneg %p999_p4 }
 0x1de   : > { %p1005_p10 = pnand %p1004_p7, %p1000_p6 }
 0x222   : > { %v456_v56 = vpop.permute.xlu2 %455 }
 0x223   : > { %461 = vst.msk [vmem:[%s335_s13] sm:$0xf] %vm450_vm8, %v456_v56 }
 0x22a   : > { %v458_v57 = vpop.permute.xlu2 %457 }
 0x22b   : > { %462 = vst.msk [vmem:[%s335_s13 + $0x4] sm:$0xf] %vm450_vm8, %v458_v57 }
 0x22c   : > { %1008 = shalt.err (!%p1005_p10)
}
 0x22d   : > { %765 = dma.vmem_to_hbm [thread:$0]  (%p1200_p8), %s516_s14, 128, %s518_s29, %s1309_s30, %s1108_s19, %s1108_s19, %s1110_s3  }
 0x22e   : > { %s342_s13 = scalar_lea.vmem [#allocation11], %s1273_s7  ;;  %s533_s15 = scalar_lea.hbm %s1377_s6, %s1276_s9 }
 0x22f   : > { %s534_s28 = sshll.u32 %s342_s13, 4  ;;  %s536_s18 = sshll.u32 %s533_s15, 4  ;;  %s535_s28 = int_to_ptr.vmem [resolvable:$true] %s534_s28  ;;  %s537_s18 = int_to_ptr.hbm [resolvable:$true] %s536_s18 }
 0x230   : > { %s1023_s11 = sshra.s32 %s537_s18, 4  ;;  %s1029_s29 = scalar_lea.hbm %s1377_s6, 16  ;;  %s1024_s11 = int_to_ptr.hbm [resolvable:$true] %s1023_s11 }
 0x231   : > { %s1025_s24 = scalar_lea.hbm %s1024_s11, 8  ;;  %p1030_p1 = scmp.lt.s32.totalorder %s1024_s11, %s1377_s6 }
 0x232   : > { %p1026_p11 = scmp.ne.s32.totalorder %s1024_s11, %s1025_s24  ;;  %p1031_p2 = scmp.lt.s32.totalorder %s1029_s29, %s1025_s24 }
 0x234   : > { %p1027_p12 = pnand %p1026_p11, %p1200_p8  ;;  %p1032_p4 = por %p1031_p2, %p1030_p1 }
 0x236   : > { %p1028_p0 = pneg %p1027_p12 }
 0x238   : > { %p1033_p6 = pnand %p1032_p4, %p1028_p0 }
 0x23a   : > { %v464_v58 = vpop.permute.xlu0 %463 }
 0x23b   : > { %469 = vst.msk [vmem:[%s342_s13] sm:$0xf] %vm450_vm8, %v464_v58 }
 0x242   : > { %v466_v59 = vpop.permute.xlu1 %465 }
 0x243   : > { %470 = vst.msk [vmem:[%s342_s13 + $0x4] sm:$0xf] %vm450_vm8, %v466_v59 }
 0x244   : > { %1036 = shalt.err (!%p1033_p6)
}
 0x245   : > { %766 = dma.vmem_to_hbm [thread:$0]  (%p1200_p8), %s535_s28, 128, %s537_s18, %s1309_s30, %s1108_s19, %s1108_s19, %s1110_s3  }
 0x246 PF: > { %s1396_s27 = sld [smem:[#allocation16_spill]]  ;;  %s551_s20 = sand.u32 1, %s1079_s21  }
 0x247   : > { %p782_p5 = pnand %p717_p13, %p1204_p9  ;;  %s552_s13 = scalar_lea.sflag [#allocation4], %s551_s20 }
 0x249   : > { %p783_p3 = pneg %p782_p5 }
 0x24b   : > { %1070 = dma.done.wait (%p783_p3), %s552_s13, 128  }
 0x24c   : > { %1072 = vsyncadd (%p783_p3), %s552_s13, 4294967168  ;;  %s1397_s16 = sadd.s32 4294967294, %s1396_s27  }
 0x24d   : > { %s561_s8 = sand.u32 1, %s1397_s16  }
 0x24e   : > { %s562_s12 = scalar_lea.sflag [#allocation10], %s561_s8 }
 0x24f   : > { %1074 = dma.done.wait (%p783_p3), %s562_s12, 256  }
 0x250   : > { %1076 = vsyncadd (%p783_p3), %s562_s12, 4294967040  ;;  %s27_s26 = sadd.s32 1, %s1396_s27   ;;  %s1398_s21 = smov %s1083_s22 }
 0x251   : > { %p24_p8 = scmp.ge.s32.totalorder %s27_s26, 4   ;;  %s1399_s22 = smov %s1087_s23 }
 0x252   : > { %s1400_s23 = smov %s1245_s10  ;;  %s1401_s24 = smov %s1095_s25 }
 0x253   : > { %s1402_s25 = smov %s1404_s17  ;;  %26 = sbr.rel (!%p24_p8) target bundleno = 12 (0xc), region = 121 }
 0x258   :  { %578 = vsyncpa [#allocation3], 1 }
 0x259   :  { %580 = vsyncpa [#allocation3 + $0x1], 1 }
 0x25a   :  { %581 = vsyncpa [#allocation6], 1 }
 0x25b   :  { %582 = vsyncpa [#allocation4], 1 }
 0x25c   :  { %584 = vsyncpa [#allocation4 + $0x1], 1 }
 0x25d   :  { %585 = vsyncpa [#allocation10], 1 }
 0x25e   :  { %587 = vsyncpa [#allocation10 + $0x1], 1 }

// kernel: tpu_custom_call.1
= control target key start
LH: loop header
LB: loop body
LE: loop exit
PB: predicated region body
PF: predicated region fallthrough
CT: control target
= control target key end

     0   :  { %s1371_s0 = inlined_call_operand.hbm [shape: f32[2,16,32], index: 0, kind: input, shape index: {}]   ;;  %s1372_s1 = inlined_call_operand.hbm [shape: f32[1,32], index: 1, kind: input, shape index: {}]   ;;  %s1373_s2 = inlined_call_operand.vmem [shape: f32[1,32], index: 2, kind: input, shape index: {}]   ;;  %s1374_s3 = inlined_call_operand.hbm [shape: bf16[32,96], index: 3, kind: input, shape index: {}]   ;;  %s1375_s4 = inlined_call_operand.hbm [shape: bf16[2,16,32], index: 4, kind: output, shape index: {0}]   ;;  %s1376_s5 = inlined_call_operand.hbm [shape: bf16[2,16,32], index: 5, kind: output, shape index: {1}]   ;;  %s1377_s6 = inlined_call_operand.hbm [shape: bf16[2,16,32], index: 6, kind: output, shape index: {2}]  }
   0x1   :  { %1382 = sst [smem:[#allocation18_spill]] %s1372_s1 }
   0x2   :  { %1383 = sst [smem:[#allocation19_spill]] %s1374_s3 }
   0x3   :  { %12 = vsyncpa [#allocation3], 0 }
   0x4   :  { %14 = vsyncpa [#allocation3 + $0x1], 0 }
   0x5   :  { %15 = vsyncpa [#allocation6], 0 }
   0x6   :  { %16 = vsyncpa [#allocation4], 0 }
   0x7   :  { %18 = vsyncpa [#allocation4 + $0x1], 0 }
   0x8   :  { %19 = vsyncpa [#allocation10], 0 }
   0x9   :  { %21 = vsyncpa [#allocation10 + $0x1], 0  ;;  %s1146_s21 = smov 0   ;;  %s1148_s22 = smov 0  }
   0xa   :  { %s1150_s23 = smov 0   ;;  %s1152_s24 = smov 0  }
   0xb   :  { %s1154_s25 = smov 0   ;;  %s1156_s26 = smov 0  }
   0xc LB: > { %1384 = sst [smem:[#allocation16_spill]] %s1099_s26  ;;  %s1177_s27 = sadd.s32 4294967295, %s1099_s26   ;;  %s1099_s26 = sphi %s1156_s26, %s27_s26   ;;  %s1095_s25 = sphi %s1154_s25, %s1402_s25   ;;  %s1091_s24 = sphi %s1152_s24, %s1401_s24   ;;  %s1087_s23 = sphi %s1150_s23, %s1400_s23   ;;  %s1083_s22 = sphi %s1148_s22, %s1399_s22   ;;  %s1079_s21 = sphi %s1146_s21, %s1398_s21  }
   0xd   : > { %s1378_s28 = sadd.s32 4294967294, %s1099_s26   ;;  %p55_p0 = scmp.ne.s32.totalorder %s1087_s23, %s1083_s22 }
   0xe   : > { %p56_p1 = scmp.eq.s32.totalorder %s1099_s26, 0  ;;  %p61_p2 = scmp.ne.s32.totalorder %s1083_s22, %s1079_s21 }
   0xf   : > { %p62_p3 = scmp.eq.s32.totalorder %s1177_s27, 0  ;;  %p150_p4 = scmp.eq.s32.totalorder %s1177_s27, 1 }
  0x10   : > { %p1188_p5 = por %p56_p1, %p55_p0  ;;  %p156_p6 = scmp.eq.s32.totalorder %s1378_s28, 1 }
  0x11   : > { %p1196_p7 = por %p62_p3, %p61_p2  ;;  %p1200_p8 = por %p150_p4, %p55_p0 }
  0x12   : > { %p1204_p9 = por %p156_p6, %p61_p2  ;;  %p714_p10 = scmp.ge.s32.totalorder %s1099_s26, 1 }
  0x13   : > { %p219_p11 = scmp.lt.s32.totalorder %s1099_s26, 3  ;;  %s1390_s1 = sld [smem:[#allocation18_spill]] }
  0x14   : > { %s1388_s9 = scalar_select %p1204_p9, 1, 0 }
  0x15   : > { %p1213_p12 = pnand %p714_p10, %p219_p11  ;;  %s1101_s14 = smov [#allocation5]  }
  0x16   : > { %1389 = sst [smem:[#allocation17_spill]] %s1388_s9  ;;  %s233_s15 = sshll.u32 %s1101_s14, 4  ;;  %s234_s15 = int_to_ptr.vmem [resolvable:$true] %s233_s15 }
  0x17   : > { %p717_p13 = scmp.ge.s32.totalorder %s1099_s26, 2  ;;  %p770_p0 = pneg %p1213_p12 }
  0x18   : > { %p793_p1 = scmp.lt.s32.totalorder %s1099_s26, 2  ;;  %s1392_s3 = sld [smem:[#allocation19_spill]] }
  0x19   : > { %s231_s12 = sshll.u32 %s1390_s1, 4  ;;  %p771_p2 = pnand %p770_p0, %p62_p3  ;;  %s232_s12 = int_to_ptr.hbm [resolvable:$true] %s231_s12 }
  0x1a   : > { %p1228_p4 = pnand %p793_p1, %p1188_p5  ;;  %s1102_s20 = smov [#allocation7]  }
  0x1b   : > { %s247_s10 = sshll.u32 %s1102_s20, 4  ;;  %s1103_s11 = smov 64   ;;  %s248_s10 = int_to_ptr.vmem [resolvable:$true] %s247_s10 }
  0x1c   : > { %773 = dma.hbm_to_vmem [thread:$0]  (!%p771_p2), %s232_s12, 16, %s234_s15, [#allocation6]  }
  0x1d   : > { %s1104_s14 = smov 4   ;;  %s261_s16 = sand.u32 1, %s1087_s23  }
  0x1e   : > { %s245_s18 = sshll.u32 %s1392_s3, 4  ;;  %s39_s17 = sadd.s32 1, %s1095_s25  ;;  %s246_s18 = int_to_ptr.hbm [resolvable:$true] %s245_s18 }
  0x1f   : > { %776 = dma.hbm_to_vmem [thread:$0]  (!%p771_p2), %s246_s18, 256, %s248_s10, [#allocation6], %s1103_s11, %s1103_s11, %s1104_s14  }
  0x20   : > { %s718_s28 = sshll.u32 %s261_s16, 4  ;;  %p41_p6 = scmp.ge.s32.totalorder %s39_s17, 2 }
  0x21   : > { %s748_s30 = sshll.u32 %s1095_s25, 4  ;;  %s265_s29 = scalar_lea.vmem [#allocation2], %s718_s28 }
  0x22   : > { %s275_s1 = sshll.u32 %s265_s29, 4  ;;  %s1404_s17 = smov (%p41_p6, %s39_s17), 0  ;;  %s276_s1 = int_to_ptr.vmem [resolvable:$true] %s275_s1 }
  0x23   : > { %s272_s12 = scalar_lea.hbm %s1371_s0, %s748_s30  ;;  %s43_s15 = ssub.s32 %s1095_s25, %s1404_s17 }
  0x24   : > { %s273_s26 = sshll.u32 %s272_s12, 4  ;;  %p46_p5 = scmp.eq.s32.totalorder %s43_s15, 0  ;;  %s274_s26 = int_to_ptr.hbm [resolvable:$true] %s273_s26 }
  0x25   : > { %s1394_s18 = sadd.s32 1, %s1087_s23  ;;  %s262_s11 = scalar_lea.sflag [#allocation3], %s261_s16 }
  0x26   : > { %s1245_s10 = scalar_select %p46_p5, %s1087_s23, %s1394_s18  }
  0x27   : > { %s1105_s14 = smov 128   ;;  %s1106_s9 = smov 8  }
  0x28   : > { %780 = dma.hbm_to_vmem [thread:$0]  (!%p1228_p4), %s274_s26, 256, %s276_s1, %s262_s11, %s1105_s14, %s1105_s14, %s1106_s9  }
  0x29   : > { %287 = sbr.rel (%p1213_p12) target bundleno = 582 (0x246), region = 36  ;;  %s1252_s3 = sand.u32 (!%p1213_p12), 1, %s1083_s22  }
  0x2a   : > { %s722_s28 = sshll.u32 (!%p1213_p12), %s1252_s3, 4  ;;  %s290_s29 = scalar_lea.sflag (!%p1213_p12), [#allocation3], %s1252_s3 }
  0x2b   : > { %s293_s30 = scalar_lea.vmem (!%p1213_p12), [#allocation2], %s722_s28 }
  0x2e   : > { %1062 = dma.done.wait (%p1196_p7), %s290_s29, 256  }
  0x2f   : > { %1064 = vsyncadd (%p1196_p7), %s290_s29, 4294967040 }
  0x30   : > { %1066 = dma.done.wait (%p62_p3), [#allocation6], 272  }
  0x31   : > { %1068 = vsyncadd (%p62_p3), [#allocation6], 4294967024  ;;  %vm352_vm0 = vcmask 261120   ;;  %v348_v0 = vld [vmem:[%s293_s30] sm:$0xff]  ;;  %v349_v2 = vld [vmem:[%s293_s30 + $0x8] sm:$0xff]  ;;  %v1107_v4 = vmov 32.0  }
  0x32   : > { %v353_v1 = vsel %vm352_vm0, %v348_v0, 0.0  ;;  %v356_v3 = vsel %vm352_vm0, %v349_v2, 0.0  ;;  %857 = vrcp.f32 %v1107_v4  ;;  %v750_v21 = vld [vmem:[#allocation7 + $0x8] sm:$0xff]  ;;  %v749_v23 = vld [vmem:[#allocation7] sm:$0xff]  ;;  %v855_v42 = vld [vmem:[#allocation5] ss:$0 sm:$0xff] }
  0x33   : > { %354 = vadd.xlane.f32.xlu0 %v353_v1  ;;  %440 = vmatpush.bf16.msra.mxu0 %v750_v21  ;;  %v856_v47 = vld [vmem:[%s1373_s2] ss:$0 sm:$0xff]  ;;  %s1273_s7 = sshll.u32 %s1252_s3, 3  ;;  %vm450_vm8 = vcmask 257024   ;;  %s1276_s9 = sshll.u32 %s1091_s24, 3 }
  0x34   : > { %s328_s13 = scalar_lea.vmem [#allocation8], %s1273_s7  ;;  %s1108_s19 = smov 64  }
  0x35   : > { %s1109_s16 = smov 96   ;;  %s495_s15 = scalar_lea.hbm %s1375_s4, %s1276_s9 }
  0x36   : > { %s496_s18 = sshll.u32 %s328_s13, 4  ;;  %s498_s11 = sshll.u32 %s495_s15, 4  ;;  %s497_s18 = int_to_ptr.vmem [resolvable:$true] %s496_s18  ;;  %s499_s11 = int_to_ptr.hbm [resolvable:$true] %s498_s11 }
  0x37   : > { %441 = vmatpush.bf16.msra.mxu0 %v749_v23  ;;  %s472_s24 = scalar_lea.sflag [#allocation4], %s1252_s3  ;;  %s967_s14 = sshra.s32 %s499_s11, 4  ;;  %s968_s14 = int_to_ptr.hbm [resolvable:$true] %s967_s14 }
  0x38   : > { %v858_v5 = vpop.eup %857  ;;  %s969_s28 = scalar_lea.hbm %s968_s14, 8  ;;  %s973_s1 = scalar_lea.hbm %s1375_s4, 16 }
  0x39   : > { %v360_v6 = vmul.f32 32.0, %v858_v5  ;;  %vm364_vm1 = vweird.f32 %v858_v5  ;;  %p970_p3 = scmp.ne.s32.totalorder %s968_s14, %s969_s28  ;;  %p974_p11 = scmp.lt.s32.totalorder %s968_s14, %s1375_s4 }
  0x3a   : > { %p975_p12 = scmp.lt.s32.totalorder %s973_s1, %s969_s28 }
  0x3b   : > { %357 = vadd.xlane.f32.xlu0 %v356_v3  ;;  %v361_v7 = vsub.f32 1.0, %v360_v6  ;;  %p971_p7 = pnand %p970_p3, %p1200_p8 }
  0x3c   : > { %p976_p0 = por %p975_p12, %p974_p11 }
  0x3d   : > { %v362_v8 = vmul.f32 %v858_v5, %v361_v7  ;;  %p972_p10 = pneg %p971_p7 }
  0x3f   : > { %v363_v9 = vadd.f32 %v858_v5, %v362_v8  ;;  %p977_p1 = pnand %p976_p0, %p972_p10 }
  0x41   : > { %v365_v10 = vsel %vm364_vm1, %v858_v5, %v363_v9 }
  0xa6   : > { %v355_v11 = vpop.xlane.xlu0 %354 }
  0xa7   : > { %v366_v12 = vmul.f32 %v365_v10, %v355_v11 }
  0xa9   : > { %v368_v13 = vsub.f32 %v348_v0, %v366_v12 }
  0xab   : > { %v370_v14 = vmul.f32 %v368_v13, %v368_v13 }
  0xad   : > { %v372_v15 = vsel %vm352_vm0, %v370_v14, 0.0 }
  0xae   : > { %373 = vadd.xlane.f32.xlu1 %v372_v15  ;;  %v358_v16 = vpop.xlane.xlu0 %357 }
  0xaf   : > { %v367_v17 = vmul.f32 %v365_v10, %v358_v16 }
  0xb1   : > { %v369_v18 = vsub.f32 %v349_v2, %v367_v17 }
  0xb3   : > { %v371_v19 = vmul.f32 %v369_v18, %v369_v18 }
  0xb5   : > { %v375_v20 = vsel %vm352_vm0, %v371_v19, 0.0 }
  0xb6   : > { %376 = vadd.xlane.f32.xlu1 %v375_v20 }
 0x121   : > { %v374_v22 = vpop.xlane.xlu1 %373 }
 0x122   : > { %v378_v24 = vmul.f32 %v374_v22, %v365_v10 }
 0x124   : > { %v380_v25 = vadd.f32 1e-05, %v378_v24 }
 0x126   : > { %859 = vrsqrt.f32 %v380_v25  ;;  %vm388_vm3 = vweird.f32 %v380_v25 }
 0x129   : > { %v377_v26 = vpop.xlane.xlu1 %376 }
 0x12a   : > { %v379_v27 = vmul.f32 %v377_v26, %v365_v10 }
 0x12c   : > { %v860_v28 = vpop.eup %859  ;;  %v381_v29 = vadd.f32 1e-05, %v379_v27 }
 0x12d   : > { %v383_v30 = vmul.f32 %v860_v28, %v380_v25  ;;  %vm389_vm2 = vweird.f32 %v860_v28 }
 0x12e   : > { %861 = vrsqrt.f32 %v381_v29  ;;  %vm390_vm4 = vmor %vm388_vm3, %vm389_vm2  ;;  %vm398_vm6 = vweird.f32 %v381_v29 }
 0x12f   : > { %v384_v31 = vmul.f32 %v860_v28, %v383_v30 }
 0x131   : > { %v385_v32 = vmul.f32 0.5, %v384_v31 }
 0x133   : > { %v386_v33 = vsub.f32 1.5, %v385_v32 }
 0x134   : > { %v862_v34 = vpop.eup %861 }
 0x135   : > { %v387_v35 = vmul.f32 %v860_v28, %v386_v33  ;;  %v393_v36 = vmul.f32 %v862_v34, %v381_v29  ;;  %vm399_vm5 = vweird.f32 %v862_v34 }
 0x136   : > { %vm400_vm7 = vmor %vm398_vm6, %vm399_vm5 }
 0x137   : > { %v394_v37 = vmul.f32 %v862_v34, %v393_v36  ;;  %v391_v38 = vsel %vm390_vm4, %v860_v28, %v387_v35 }
 0x138   : > { %v402_v41 = vmul.f32 %v391_v38, %v368_v13 }
 0x139   : > { %v395_v39 = vmul.f32 0.5, %v394_v37 }
 0x13a   : > { %v407_v46 = vmul.f32 %v855_v42, %v402_v41 }
 0x13b   : > { %v396_v40 = vsub.f32 1.5, %v395_v39 }
 0x13c   : > { %v412_v49 = vadd.f32 %v856_v47, %v407_v46 }
 0x13d   : > { %v397_v43 = vmul.f32 %v862_v34, %v396_v40 }
 0x13f   : > { %v401_v44 = vsel %vm400_vm7, %v862_v34, %v397_v43 }
 0x140   : > { %v403_v45 = vmul.f32 %v401_v44, %v369_v18 }
 0x142   : > { %v408_v48 = vmul.f32 %v855_v42, %v403_v45 }
 0x144   : > { %v413_v50 = vadd.f32 %v856_v47, %v408_v48 }
 0x146   : > { %v414_v51 = vpack.c.bf16 %v413_v50, %v412_v49 }
 0x148   : > { %736 = vmatmul.msk.bf16.vlgmr.msra.gmra.mxu0 %vm352_vm0, %v414_v51 }
 0x1c5   : > { %v443_v52 = vpop.f32.mrf.mxu0 }
 0x1c6   : > { %v448_v53 = vpack.c.bf16 %v443_v52, %v443_v52 }
 0x1c8   : > { %451 = vst.msk [vmem:[%s328_s13] sm:$0xf] %vm450_vm8, %v448_v53  ;;  %463 = vrot.lane.b32.xlu0 %v448_v53, %s1108_s19  ;;  %455 = vrot.lane.b32.xlu2 %v448_v53, %s1109_s16 }
 0x1cd   : > { %v445_v54 = vpop.f32.mrf.mxu0 }
 0x1ce   : > { %v449_v55 = vpack.c.bf16 %v445_v54, %v445_v54 }
 0x1d0   : > { %452 = vst.msk [vmem:[%s328_s13 + $0x4] sm:$0xf] %vm450_vm8, %v449_v55  ;;  %465 = vrot.lane.b32.xlu1 %v449_v55, %s1108_s19  ;;  %457 = vrot.lane.b32.xlu2 %v449_v55, %s1109_s16 }
 0x1d1   : > { %980 = shalt.err (!%p977_p1)
}
 0x1d2   : > { %s1110_s3 = smov 4   ;;  %s335_s13 = scalar_lea.vmem [#allocation9], %s1273_s7 }
 0x1d3   : > { %764 = dma.vmem_to_hbm [thread:$0]  (%p1200_p8), %s497_s18, 128, %s499_s11, %s472_s24, %s1108_s19, %s1108_s19, %s1110_s3  }
 0x1d4   : > { %s514_s15 = scalar_lea.hbm %s1376_s5, %s1276_s9  ;;  %s515_s14 = sshll.u32 %s335_s13, 4  ;;  %s516_s14 = int_to_ptr.vmem [resolvable:$true] %s515_s14 }
 0x1d5   : > { %s476_s28 = sand.u32 1, %s1177_s27   ;;  %s517_s29 = sshll.u32 %s514_s15, 4  ;;  %s518_s29 = int_to_ptr.hbm [resolvable:$true] %s517_s29 }
 0x1d6   : > { %s1309_s30 = scalar_lea.sflag [#allocation10], %s476_s28  ;;  %s995_s18 = sshra.s32 %s518_s29, 4  ;;  %s996_s18 = int_to_ptr.hbm [resolvable:$true] %s995_s18 }
 0x1d7   : > { %s997_s11 = scalar_lea.hbm %s996_s18, 8  ;;  %s1001_s26 = scalar_lea.hbm %s1376_s5, 16 }
 0x1d8   : > { %p998_p2 = scmp.ne.s32.totalorder %s996_s18, %s997_s11  ;;  %p1002_p5 = scmp.lt.s32.totalorder %s996_s18, %s1376_s5 }
 0x1d9   : > { %p1003_p3 = scmp.lt.s32.totalorder %s1001_s26, %s997_s11 }
 0x1da   : > { %p999_p4 = pnand %p998_p2, %p1200_p8 }
 0x1db   : > { %p1004_p7 = por %p1003_p3, %p1002_p5 }
 0x1dc   : > { %p1000_p6 = pneg %p999_p4 }
 0x1de   : > { %p1005_p10 = pnand %p1004_p7, %p1000_p6 }
 0x222   : > { %v456_v56 = vpop.permute.xlu2 %455 }
 0x223   : > { %461 = vst.msk [vmem:[%s335_s13] sm:$0xf] %vm450_vm8, %v456_v56 }
 0x22a   : > { %v458_v57 = vpop.permute.xlu2 %457 }
 0x22b   : > { %462 = vst.msk [vmem:[%s335_s13 + $0x4] sm:$0xf] %vm450_vm8, %v458_v57 }
 0x22c   : > { %1008 = shalt.err (!%p1005_p10)
}
 0x22d   : > { %765 = dma.vmem_to_hbm [thread:$0]  (%p1200_p8), %s516_s14, 128, %s518_s29, %s1309_s30, %s1108_s19, %s1108_s19, %s1110_s3  }
 0x22e   : > { %s342_s13 = scalar_lea.vmem [#allocation11], %s1273_s7  ;;  %s533_s15 = scalar_lea.hbm %s1377_s6, %s1276_s9 }
 0x22f   : > { %s534_s28 = sshll.u32 %s342_s13, 4  ;;  %s536_s18 = sshll.u32 %s533_s15, 4  ;;  %s535_s28 = int_to_ptr.vmem [resolvable:$true] %s534_s28  ;;  %s537_s18 = int_to_ptr.hbm [resolvable:$true] %s536_s18 }
 0x230   : > { %s1023_s11 = sshra.s32 %s537_s18, 4  ;;  %s1029_s29 = scalar_lea.hbm %s1377_s6, 16  ;;  %s1024_s11 = int_to_ptr.hbm [resolvable:$true] %s1023_s11 }
 0x231   : > { %s1025_s24 = scalar_lea.hbm %s1024_s11, 8  ;;  %p1030_p1 = scmp.lt.s32.totalorder %s1024_s11, %s1377_s6 }
 0x232   : > { %p1026_p11 = scmp.ne.s32.totalorder %s1024_s11, %s1025_s24  ;;  %p1031_p2 = scmp.lt.s32.totalorder %s1029_s29, %s1025_s24 }
 0x234   : > { %p1027_p12 = pnand %p1026_p11, %p1200_p8  ;;  %p1032_p4 = por %p1031_p2, %p1030_p1 }
 0x236   : > { %p1028_p0 = pneg %p1027_p12 }
 0x238   : > { %p1033_p6 = pnand %p1032_p4, %p1028_p0 }
 0x23a   : > { %v464_v58 = vpop.permute.xlu0 %463 }
 0x23b   : > { %469 = vst.msk [vmem:[%s342_s13] sm:$0xf] %vm450_vm8, %v464_v58 }
 0x242   : > { %v466_v59 = vpop.permute.xlu1 %465 }
 0x243   : > { %470 = vst.msk [vmem:[%s342_s13 + $0x4] sm:$0xf] %vm450_vm8, %v466_v59 }
 0x244   : > { %1036 = shalt.err (!%p1033_p6)
}
 0x245   : > { %766 = dma.vmem_to_hbm [thread:$0]  (%p1200_p8), %s535_s28, 128, %s537_s18, %s1309_s30, %s1108_s19, %s1108_s19, %s1110_s3  }
 0x246 PF: > { %s1396_s27 = sld [smem:[#allocation16_spill]]  ;;  %s551_s20 = sand.u32 1, %s1079_s21  }
 0x247   : > { %p782_p5 = pnand %p717_p13, %p1204_p9  ;;  %s552_s13 = scalar_lea.sflag [#allocation4], %s551_s20 }
 0x249   : > { %p783_p3 = pneg %p782_p5 }
 0x24b   : > { %1070 = dma.done.wait (%p783_p3), %s552_s13, 128  }
 0x24c   : > { %1072 = vsyncadd (%p783_p3), %s552_s13, 4294967168  ;;  %s1397_s16 = sadd.s32 4294967294, %s1396_s27  }
 0x24d   : > { %s561_s8 = sand.u32 1, %s1397_s16  }
 0x24e   : > { %s562_s12 = scalar_lea.sflag [#allocation10], %s561_s8 }
 0x24f   : > { %1074 = dma.done.wait (%p783_p3), %s562_s12, 256  }
 0x250   : > { %1076 = vsyncadd (%p783_p3), %s562_s12, 4294967040  ;;  %s27_s26 = sadd.s32 1, %s1396_s27   ;;  %s1398_s21 = smov %s1083_s22 }
 0x251   : > { %p24_p8 = scmp.ge.s32.totalorder %s27_s26, 4   ;;  %s1399_s22 = smov %s1087_s23 }
 0x252   : > { %s1400_s23 = smov %s1245_s10  ;;  %s1401_s24 = smov %s1095_s25 }
 0x253   : > { %s1402_s25 = smov %s1404_s17  ;;  %26 = sbr.rel (!%p24_p8) target bundleno = 12 (0xc), region = 121 }
 0x258   :  { %578 = vsyncpa [#allocation3], 1 }
 0x259   :  { %580 = vsyncpa [#allocation3 + $0x1], 1 }
 0x25a   :  { %581 = vsyncpa [#allocation6], 1 }
 0x25b   :  { %582 = vsyncpa [#allocation4], 1 }
 0x25c   :  { %584 = vsyncpa [#allocation4 + $0x1], 1 }
 0x25d   :  { %585 = vsyncpa [#allocation10], 1 }
 0x25e   :  { %587 = vsyncpa [#allocation10 + $0x1], 1 }

</bundles_post_ra>
